<compile_context>
chip_gen: v7x
topology: tpu7x:2x2x1
jax: 0.10.0
libtpu: 0.0.40
codegen_flags: <defaults>
</compile_context>

<pallas_src>
import functools

import jax
import jax.numpy as jnp
from jax import lax
from jax.experimental import pallas as pl
from jax.experimental.pallas import tpu as pltpu


def _round_up(x, m):
    return ((x + m - 1) // m) * m


def _row_granularity(*dtypes):
    """Sublane granularity for the packed input dtypes: f32->8, bf16->16, i8->32."""
    g = 8
    for dt in dtypes:
        g = max(g, 32 // max(1, jnp.dtype(dt).itemsize))
    return g


def _default_num_partials():
    """2 on parts with two TensorCores per device (v4/v5p/v7x), else 1."""
    try:
        kind = jax.devices()[0].device_kind.lower()
    except Exception:
        return 1
    for tag in ("v4", "v5p", "v7", "7x"):
        if tag in kind:
            return 2
    return 1


def _wbce_kernel(x_ref, t_ref, w_ref, o_ref, *,
                 tile_rows, tiles_per_part, batch, n_real_blocks,
                 chunk_rows, has_tail, has_oob):
    p = pl.program_id(0)                       # parallel partial (multi-TC) axis
    i = pl.program_id(1)                       # reduction axis over row tiles
    g = p * tiles_per_part + i                 # global row-block index

    @pl.when(i == 0)
    def _init():
        o_ref[...] = jnp.zeros_like(o_ref)

    c = o_ref.shape[1]
    n_chunks = tile_rows // chunk_rows
    rem_rows = tile_rows - n_chunks * chunk_rows        # multiple of 8

    def chunk_partial(rows, r0, masked, row0):
        # rows: static chunk height (multiple of 8); r0: row offset within tile.
        x = x_ref[pl.ds(r0, rows), :].astype(jnp.float32)
        t = t_ref[pl.ds(r0, rows), :].astype(jnp.float32)
        # BCEWithLogitsLoss(reduction='none'), numerically stable.
        loss = jnp.maximum(x, 0.0) - x * t + jnp.log1p(jnp.exp(-jnp.abs(x)))
        if masked:
            # Cheap (rows, 1) iota; the select broadcasts over lanes. Kept AFTER
            # the transcendentals so padded/garbage rows never reach the sum.
            ridx = lax.broadcasted_iota(jnp.int32, (rows, 1), 0)
            loss = jnp.where(ridx + (row0 + r0) < batch, loss, 0.0)
        # Row-group reduce to a lane-dense (8, C) partial: pure VPU adds.
        return loss.reshape(rows // 8, 8, c).sum(axis=0)

    def accumulate(masked):
        row0 = g * tile_rows

        def body(j, acc):
            r0 = pl.multiple_of(j * chunk_rows, chunk_rows)
            return acc + chunk_partial(chunk_rows, r0, masked, row0)

        if n_chunks == 1:
            acc = chunk_partial(chunk_rows, 0, masked, row0)
        else:
            acc = lax.fori_loop(0, n_chunks, body, jnp.zeros((8, c), jnp.float32))
        if rem_rows:
            acc = acc + chunk_partial(rem_rows, n_chunks * chunk_rows, masked, row0)
        # Weights already carry the 1/(B*C) mean factor.
        o_ref[...] += acc * w_ref[...]

    if has_tail:
        last = n_real_blocks - 1
        # Everything before the last real block is fully in-bounds (unmasked
        # fast path); only the straddling block pays for masking; blocks past
        # the real data (if any) are skipped entirely.

        @pl.when(g < last)
        def _full():
            accumulate(False)

        @pl.when(g == last)
        def _tail():
            accumulate(True)
    elif has_oob:
        @pl.when(g < n_real_blocks)
        def _full():
            accumulate(False)
    else:
        accumulate(False)


def weighted_bce_loss(inputs, targets, weights, *,
                      tile_rows=None, num_partials=None,
                      input_vmem_budget_bytes=24 << 20):
    """inputs, targets: (B, C); weights: (C,) or (1, C). Returns scalar f32.

    inputs may be f32/bf16; targets may be f32/bf16/int8/bool (upcast in-kernel).
    """
    B, C = inputs.shape
    assert targets.shape == (B, C)

    xb = jnp.dtype(inputs.dtype).itemsize
    tb = jnp.dtype(targets.dtype).itemsize
    gran = _row_granularity(inputs.dtype, targets.dtype)

    if num_partials is None:
        num_partials = _default_num_partials()
    num_partials = max(1, min(int(num_partials), pl.cdiv(B, gran)))

    # --- Tile planning -----------------------------------------------------
    # Honest cap: double-buffered (x + t) bytes per row-block must fit the
    # input VMEM budget.
    if tile_rows is None:
        bytes_per_row = C * (xb + tb)
        cap = input_vmem_budget_bytes // (2 * max(1, bytes_per_row))
        cap = max(gran, (cap // gran) * gran)
    else:
        assert tile_rows % 8 == 0, "tile_rows must be a multiple of 8"
        cap = int(tile_rows)

    # Balanced split: both partials get the same number of tiles; tile_rows is
    # derived from B / total so that (whenever the cap allows) only the final
    # tile of the final partial straddles the batch.
    rows_per_part = pl.cdiv(B, num_partials)
    tiles_per_part = pl.cdiv(rows_per_part, cap)
    total_blocks = num_partials * tiles_per_part
    if tile_rows is None:
        tile_rows = min(cap, _round_up(pl.cdiv(B, total_blocks), gran))
    else:
        tile_rows = cap

    n_real_blocks = pl.cdiv(B, tile_rows)
    has_tail = (B % tile_rows) != 0
    has_oob = total_blocks > n_real_blocks

    # Inner chunk size: bounds the f32 temps to ~<=512 rows x C (~256 KiB).
    chunk_cap_bytes = 256 << 10
    chunk_rows = max(gran, min(512, (chunk_cap_bytes // (4 * C)) // gran * gran))
    chunk_rows = min(chunk_rows, tile_rows)

    # Fold the mean's 1/(B*C) into the per-class weights once; pre-broadcast to
    # a full sublane tile so no per-tile sublane broadcast is needed.
    w = jnp.reshape(weights, (1, C)).astype(jnp.float32) * (1.0 / float(B * C))
    w8 = jnp.broadcast_to(w, (8, C))

    def xt_map(p, i):
        g = p * tiles_per_part + i
        # Clamp (rare, only with user-forced tiny tiles) fully-out-of-bounds
        # blocks onto the last real block; their compute is skipped in-kernel.
        return (jnp.minimum(g, n_real_blocks - 1), 0)

    kernel = functools.partial(
        _wbce_kernel,
        tile_rows=int(tile_rows),
        tiles_per_part=int(tiles_per_part),
        batch=int(B),
        n_real_blocks=int(n_real_blocks),
        chunk_rows=int(chunk_rows),
        has_tail=bool(has_tail),
        has_oob=bool(has_oob),
    )

    # Honest working-set estimate: double-buffered input blocks + resident
    # out/weights blocks + f32 chunk temps + slack. Raise the scoped VMEM
    # limit explicitly (v5e default is only 16 MiB); defaults stay well under
    # v7x's 64 MiB physical VMEM.
    working_set = (2 * tile_rows * C * (xb + tb)
                   + 4 * 8 * C * 4
                   + 6 * chunk_rows * C * 4
                   + (2 << 20))
    vmem_limit = int(min(max(32 << 20, working_set + (8 << 20)), 112 << 20))

    cost = pl.CostEstimate(
        flops=int(9 * B * C),
        transcendentals=int(2 * B * C),
        bytes_accessed=int(B * C * (xb + tb) + (num_partials + 1) * 8 * C * 4),
    )

    partials = pl.pallas_call(
        kernel,
        out_shape=jax.ShapeDtypeStruct((num_partials * 8, C), jnp.float32),
        grid_spec=pltpu.PrefetchScalarGridSpec(
            num_scalar_prefetch=0,
            grid=(num_partials, tiles_per_part),
            in_specs=[
                pl.BlockSpec((tile_rows, C), xt_map),          # logits tile
                pl.BlockSpec((tile_rows, C), xt_map),          # targets tile
                pl.BlockSpec((8, C), lambda p, i: (0, 0)),     # weights (resident)
            ],
            # Same block across the reduction axis i -> resident accumulator;
            # one lane-dense (8, C) block per parallel partial p.
            out_specs=pl.BlockSpec((8, C), lambda p, i: (p, 0)),
        ),
        compiler_params=pltpu.CompilerParams(
            dimension_semantics=("parallel", "arbitrary"),
            vmem_limit_bytes=vmem_limit,
        ),
        cost_estimate=cost,
    )(inputs, targets, w8)

    # Tiny final cross-lane reduce (num_partials * 8 * C elements) done by XLA.
    return jnp.sum(partials)


def _reference(inputs, targets, weights):
    x = inputs.astype(jnp.float32)
    t = targets.astype(jnp.float32)
    w = jnp.reshape(weights, (1, -1)).astype(jnp.float32)
    loss = jnp.maximum(x, 0.0) - x * t + jnp.log1p(jnp.exp(-jnp.abs(x)))
    return jnp.mean(loss * w)


if __name__ == "__main__":
    key = jax.random.PRNGKey(0)

    def make_case(key, B, C, x_dtype=jnp.float32, t_dtype=jnp.bfloat16):
        k1, k2, k3 = jax.random.split(key, 3)
        x = (jax.random.normal(k1, (B, C), dtype=jnp.float32) * 2.0).astype(x_dtype)
        # targets are exactly 0/1 -> bf16/int8 are lossless and cut HBM traffic
        t = (jax.random.uniform(k2, (B, C)) > 0.5).astype(t_dtype)
        w = jax.random.uniform(k3, (C,), dtype=jnp.float32, minval=0.5, maxval=2.0)
        return x, t, w

    ks = jax.random.split(key, 5)

    # 1) Small canonical multi-label shape (single tile).
    x, t, w = make_case(ks[0], 16, 128)
    out = jax.block_until_ready(weighted_bce_loss(x, t, w))
    ref = _reference(x, t, w)
    assert jnp.allclose(out, ref, atol=1e-5, rtol=1e-5), (out, ref)

    # 2) Batch not divisible by the tile -> straddling-tile mask path.
    x, t, w = make_case(ks[1], 20, 128)
    out = jax.block_until_ready(weighted_bce_loss(x, t, w))
    ref = _reference(x, t, w)
    assert jnp.allclose(out, ref, atol=1e-5, rtol=1e-5), (out, ref)

    # 3) Forced tiny tiles + 2 partials (odd real-block count -> OOB-skip path).
    x, t, w = make_case(ks[2], 40, 128)
    out = jax.block_until_ready(
        weighted_bce_loss(x, t, w, tile_rows=8, num_partials=2))
    ref = _reference(x, t, w)
    assert jnp.allclose(out, ref, atol=1e-5, rtol=1e-5), (out, ref)

    # 4) bf16 logits + bf16 targets, balanced 2-way split, tail only on the
    #    final tile of the final partial.
    x, t, w = make_case(ks[3], 48, 128, x_dtype=jnp.bfloat16)
    out = jax.block_until_ready(weighted_bce_loss(x, t, w, num_partials=2))
    ref = _reference(x, t, w)
    assert jnp.allclose(out, ref, atol=1e-5, rtol=1e-5), (out, ref)

    # 5) bf16 logits + int8 targets (3 B/elem HBM traffic), 32-row granularity.
    x, t, w = make_case(ks[4], 64, 128, x_dtype=jnp.bfloat16, t_dtype=jnp.int8)
    out = jax.block_until_ready(weighted_bce_loss(x, t, w))
    ref = _reference(x, t, w)
    assert jnp.allclose(out, ref, atol=1e-5, rtol=1e-5), (out, ref)

    print("KERNEL_OK")
</pallas_src>

<mosaic_0001>
module attributes {stable_mosaic.version = 11 : i64} {
  func.func @_wbce_kernel(%arg0: i32, %arg1: i32, %arg2: memref<16x128xf32, #tpu.memory_space<vmem>>, %arg3: memref<16x128xbf16, #tpu.memory_space<vmem>>, %arg4: memref<8x128xf32, #tpu.memory_space<vmem>>, %arg5: memref<8x128xf32, #tpu.memory_space<vmem>>) attributes {dimension_semantics = [#tpu.dimension_semantics<parallel>, #tpu.dimension_semantics<arbitrary>], iteration_bounds = array<i64: 1, 1>, scalar_prefetch = 0 : i64, scratch_operands = 0 : i64, tpu.core_type = #tpu.core_type<tc>, window_params = [{transform_indices = @transform_0, window_bounds = array<i64: 16, 128>}, {transform_indices = @transform_1, window_bounds = array<i64: 16, 128>}, {pipeline_mode = #tpu.pipeline_mode<synchronous>, transform_indices = @transform_2, window_bounds = array<i64: 8, 128>}, {transform_indices = @transform_3, window_bounds = array<i64: 8, 128>}]} {
    %c0_i32 = arith.constant 0 : i32
    %0 = arith.cmpi eq, %arg1, %c0_i32 : i32
    %1 = arith.extui %0 : i1 to i32
    %c0_i32_0 = arith.constant 0 : i32
    %2 = arith.cmpi ne, %1, %c0_i32_0 : i32
    scf.if %2 {
      %cst_12 = arith.constant 0.000000e+00 : f32
      %23 = vector.broadcast %cst_12 : f32 to vector<8x128xf32>
      %c0_13 = arith.constant 0 : index
      %c0_14 = arith.constant 0 : index
      %24 = vector.load %arg5[%c0_13, %c0_14] : memref<8x128xf32, #tpu.memory_space<vmem>>, vector<8x128xf32>
      tpu.vector_store %arg5[%c0_13, %c0_14], %23 {strides = array<i32>} : memref<8x128xf32, #tpu.memory_space<vmem>>, vector<8x128xf32>,
    } else {
    }
    %c0 = arith.constant 0 : index
    %c0_1 = arith.constant 0 : index
    %3 = vector.load %arg2[%c0, %c0_1] : memref<16x128xf32, #tpu.memory_space<vmem>>, vector<16x128xf32>
    %c0_2 = arith.constant 0 : index
    %c0_3 = arith.constant 0 : index
    %4 = vector.load %arg3[%c0_2, %c0_3] : memref<16x128xbf16, #tpu.memory_space<vmem>>, vector<16x128xbf16>
    %5 = arith.extf %4 : vector<16x128xbf16> to vector<16x128xf32>
    %cst = arith.constant 0.000000e+00 : f32
    %6 = vector.broadcast %cst : f32 to vector<16x128xf32>
    %7 = arith.maximumf %3, %6 : vector<16x128xf32>
    %8 = arith.mulf %3, %5 : vector<16x128xf32>
    %9 = arith.subf %7, %8 : vector<16x128xf32>
    %10 = math.absf %3 : vector<16x128xf32>
    %cst_4 = arith.constant 0.000000e+00 : f32
    %11 = vector.broadcast %cst_4 : f32 to vector<16x128xf32>
    %12 = arith.subf %11, %10 : vector<16x128xf32>
    %13 = math.exp %12 : vector<16x128xf32>
    %14 = math.log1p %13 : vector<16x128xf32>
    %15 = arith.addf %9, %14 : vector<16x128xf32>
    %16 = vector.shape_cast %15 : vector<16x128xf32> to vector<2x8x128xf32>
    %cst_5 = arith.constant dense<0.000000e+00> : vector<8x128xf32>
    %17 = vector.multi_reduction <add>, %16, %cst_5 [0] : vector<2x8x128xf32> to vector<8x128xf32>
    %c0_6 = arith.constant 0 : index
    %c0_7 = arith.constant 0 : index
    %18 = vector.load %arg5[%c0_6, %c0_7] : memref<8x128xf32, #tpu.memory_space<vmem>>, vector<8x128xf32>
    %c0_8 = arith.constant 0 : index
    %c0_9 = arith.constant 0 : index
    %19 = vector.load %arg4[%c0_8, %c0_9] : memref<8x128xf32, #tpu.memory_space<vmem>>, vector<8x128xf32>
    %20 = arith.mulf %17, %19 : vector<8x128xf32>
    %21 = arith.addf %18, %20 : vector<8x128xf32>
    %c0_10 = arith.constant 0 : index
    %c0_11 = arith.constant 0 : index
    %22 = vector.load %arg5[%c0_10, %c0_11] : memref<8x128xf32, #tpu.memory_space<vmem>>, vector<8x128xf32>
    tpu.vector_store %arg5[%c0_10, %c0_11], %21 {strides = array<i32>} : memref<8x128xf32, #tpu.memory_space<vmem>>, vector<8x128xf32>,
    return
  }
  func.func @transform_0(%arg0: i32, %arg1: i32) -> (i32, i32) {
    %c1_i32 = arith.constant 1 : i32
    %0 = arith.muli %arg0, %c1_i32 : i32
    %1 = arith.addi %0, %arg1 : i32
    %c0_i32 = arith.constant 0 : i32
    %2 = arith.minsi %1, %c0_i32 : i32
    %c0_i32_0 = arith.constant 0 : i32
    %c0_i32_1 = arith.constant 0 : i32
    return %2, %c0_i32_0 : i32, i32
  }
  func.func @transform_1(%arg0: i32, %arg1: i32) -> (i32, i32) {
    %c1_i32 = arith.constant 1 : i32
    %0 = arith.muli %arg0, %c1_i32 : i32
    %1 = arith.addi %0, %arg1 : i32
    %c0_i32 = arith.constant 0 : i32
    %2 = arith.minsi %1, %c0_i32 : i32
    %c0_i32_0 = arith.constant 0 : i32
    %c0_i32_1 = arith.constant 0 : i32
    return %2, %c0_i32_0 : i32, i32
  }
  func.func @transform_2(%arg0: i32, %arg1: i32) -> (i32, i32) {
    %c0_i32 = arith.constant 0 : i32
    %c0_i32_0 = arith.constant 0 : i32
    %c0_i32_1 = arith.constant 0 : i32
    return %c0_i32, %c0_i32_0 : i32, i32
  }
  func.func @transform_3(%arg0: i32, %arg1: i32) -> (i32, i32) {
    %c0_i32 = arith.constant 0 : i32
    %c0_i32_0 = arith.constant 0 : i32
    return %arg0, %c0_i32 : i32, i32
  }
}

</mosaic_0001>

<bundles_post_ra>
// kernel: tpu_custom_call.1
= control target key start
LH: loop header
LB: loop body
LE: loop exit
PB: predicated region body
PF: predicated region fallthrough
CT: control target
= control target key end

     0   :  { %8 = vsyncpa [#allocation3], 0  ;;  %s336_s0 = inlined_call_operand.hbm [shape: f32[16,128], index: 0, kind: input, shape index: {}]   ;;  %s337_s1 = inlined_call_operand.hbm [shape: bf16[16,128], index: 1, kind: input, shape index: {}]   ;;  %s338_s2 = inlined_call_operand.hbm [shape: f32[8,128], index: 2, kind: input, shape index: {}]   ;;  %s339_s3 = inlined_call_operand.hbm [shape: f32[8,128], index: 3, kind: output, shape index: {}]  }
   0x1   :  { %9 = vsyncpa [#allocation6], 0 }
   0x2   :  { %10 = vsyncpa [#allocation4], 0  ;;  %s260_s12 = smov [#allocation5]   ;;  %s166_s16 = scalar_lea.hbm %s337_s1, 128 }
   0x3   :  { %s40_s13 = sshll.u32 %s260_s12, 4  ;;  %p167_p0 = scmp.ne.s32.totalorder %s337_s1, %s166_s16  ;;  %s41_s13 = int_to_ptr.vmem [resolvable:$true] %s40_s13 }
   0x4   :  { %p170_p1 = scmp.lt.u32.totalorder %s166_s16, %s337_s1 }
   0x6   :  { %p172_p2 = pnand %p170_p1, %p167_p0 }
   0x8   :  { %175 = shalt.err (!%p172_p2)
}
   0x9   :  { %s176_s21 = scalar_lea.vmem %s41_s13, 128  ;;  %p181_p4 = scmp.lt.s32.totalorder %s41_s13, %s41_s13 }
   0xa   :  { %p177_p3 = scmp.ne.s32.totalorder %s41_s13, %s176_s21  ;;  %p182_p5 = scmp.lt.s32.totalorder %s176_s21, %s176_s21 }
   0xc   :  { %p183_p6 = por %p182_p5, %p181_p4 }
   0xe   :  { %p184_p7 = pnand %p183_p6, %p177_p3 }
  0x10   :  { %187 = shalt.err (!%p184_p7)
}
  0x11   :  { %s261_s22 = smov 64   ;;  %s262_s23 = smov 4  }
  0x12   :  { %46 = dma.hbm_to_vmem [thread:$0]  %s337_s1, 128, %s41_s13, [#allocation6], %s261_s22, %s261_s22, %s262_s23  }
  0x13   :  { %s263_s26 = smov [#allocation2]   ;;  %s188_s30 = scalar_lea.hbm %s336_s0, 256 }
  0x14   :  { %s22_s27 = sshll.u32 %s263_s26, 4  ;;  %p189_p8 = scmp.ne.s32.totalorder %s336_s0, %s188_s30  ;;  %s23_s27 = int_to_ptr.vmem [resolvable:$true] %s22_s27 }
  0x15   :  { %p192_p9 = scmp.lt.u32.totalorder %s188_s30, %s336_s0 }
  0x17   :  { %p194_p10 = pnand %p192_p9, %p189_p8 }
  0x19   :  { %197 = shalt.err (!%p194_p10)
}
  0x1a   :  { %s198_s8 = scalar_lea.vmem %s23_s27, 256  ;;  %p203_p12 = scmp.lt.s32.totalorder %s23_s27, %s23_s27 }
  0x1b   :  { %p199_p11 = scmp.ne.s32.totalorder %s23_s27, %s198_s8  ;;  %p204_p13 = scmp.lt.s32.totalorder %s198_s8, %s198_s8 }
  0x1d   :  { %p205_p0 = por %p204_p13, %p203_p12 }
  0x1f   :  { %p206_p1 = pnand %p205_p0, %p199_p11 }
  0x21   :  { %209 = shalt.err (!%p206_p1)
}
  0x22   :  { %s264_s1 = smov 128   ;;  %s265_s9 = smov 8  }
  0x23   :  { %28 = dma.hbm_to_vmem [thread:$0]  %s336_s0, 256, %s23_s27, [#allocation3], %s264_s1, %s264_s1, %s265_s9  }
  0x24   :  { %s266_s12 = smov [#allocation7]   ;;  %s210_s16 = scalar_lea.hbm %s338_s2, 128 }
  0x25   :  { %s53_s13 = sshll.u32 %s266_s12, 4  ;;  %p211_p2 = scmp.ne.s32.totalorder %s338_s2, %s210_s16  ;;  %s54_s13 = int_to_ptr.vmem [resolvable:$true] %s53_s13 }
  0x26   :  { %p214_p3 = scmp.lt.u32.totalorder %s210_s16, %s338_s2 }
  0x28   :  { %p216_p4 = pnand %p214_p3, %p211_p2 }
  0x2a   :  { %219 = shalt.err (!%p216_p4)
}
  0x2b   :  { %s220_s21 = scalar_lea.vmem %s54_s13, 128  ;;  %p225_p6 = scmp.lt.s32.totalorder %s54_s13, %s54_s13 }
  0x2c   :  { %p221_p5 = scmp.ne.s32.totalorder %s54_s13, %s220_s21  ;;  %p226_p7 = scmp.lt.s32.totalorder %s220_s21, %s220_s21 }
  0x2e   :  { %p227_p8 = por %p226_p7, %p225_p6 }
  0x30   :  { %p228_p9 = pnand %p227_p8, %p221_p5 }
  0x32   :  { %231 = shalt.err (!%p228_p9)
}
  0x33   :  { %56 = dma.hbm_to_vmem [thread:$0]  %s338_s2, 128, %s54_s13, [#allocation6]  }
  0x34   :  { %254 = dma.done.wait [#allocation3], 256  }
  0x35   :  { %255 = vsyncadd [#allocation3], 4294967040 }
  0x36   :  { %256 = dma.done.wait [#allocation6], 256  }
  0x37   :  { %257 = vsyncadd [#allocation6], 4294967040  ;;  %v79_v0 = vld [vmem:[#allocation2] sm:$0xff]  ;;  %v80_v1 = vld [vmem:[#allocation2 + $0x8] sm:$0xff]  ;;  %s267_s2 = smov [#allocation8]  }
  0x38   :  { %v91_v2 = vand.u32 2147483647, %v79_v0  ;;  %v92_v3 = vand.u32 2147483647, %v80_v1  ;;  %v146_v11 = vld [vmem:[#allocation5] sm:$0xff]   ;;  %v85_v18 = vmax.f32 %v79_v0, 0.0 }
  0x39   :  { %v147_v14 = vunpack.c.l.bf16 %v146_v11  ;;  %v148_v16 = vunpack.c.h.bf16 %v146_v11  ;;  %v86_v22 = vmax.f32 %v80_v1, 0.0  ;;  %v121_v37 = vld [vmem:[#allocation7] sm:$0xff]  ;;  %s131_s23 = sshll.u32 %s267_s2, 4  ;;  %s132_s23 = int_to_ptr.vmem [resolvable:$true] %s131_s23 }
  0x3a   :  { %v93_v4 = vsub.f32 0.0, %v91_v2  ;;  %v94_v5 = vsub.f32 0.0, %v92_v3  ;;  %s232_s24 = scalar_lea.vmem %s132_s23, 128  ;;  %p237_p11 = scmp.lt.s32.totalorder %s132_s23, %s132_s23 }
  0x3b   :  { %v87_v19 = vmul.f32 %v147_v14, %v79_v0  ;;  %v88_v23 = vmul.f32 %v148_v16, %v80_v1  ;;  %p233_p10 = scmp.ne.s32.totalorder %s132_s23, %s232_s24  ;;  %p238_p12 = scmp.lt.s32.totalorder %s232_s24, %s232_s24 }
  0x3c   :  { %v95_v6 = vmul.f32 1.442695, %v93_v4  ;;  %v97_v7 = vmul.f32 1.442695, %v94_v5 }
  0x3d   :  { %v89_v27 = vsub.f32 %v85_v18, %v87_v19  ;;  %v90_v30 = vsub.f32 %v86_v22, %v88_v23  ;;  %p239_p13 = por %p238_p12, %p237_p11 }
  0x3e   :  { %158 = vpow2.f32 %v95_v6 }
  0x3f   :  { %160 = vpow2.f32 %v97_v7  ;;  %p240_p0 = pnand %p239_p13, %p233_p10 }
  0x48   :  { %v159_v8 = vpop.eup %158 }
  0x49   :  { %v161_v9 = vpop.eup %160  ;;  %v99_v10 = vadd.f32 1.0, %v159_v8  ;;  %v102_v13 = vmul.f32 -0.5, %v159_v8  ;;  %v105_v20 = vand.u32 2147483647, %v159_v8 }
  0x4a   :  { %v108_v12 = vadd.f32 1.0, %v161_v9  ;;  %v111_v15 = vmul.f32 -0.5, %v161_v9  ;;  %v114_v24 = vand.u32 2147483647, %v161_v9 }
  0x4b   :  { %162 = vlog2.f32 %v99_v10  ;;  %v103_v17 = vadd.f32 1.0, %v102_v13  ;;  %vm106_vm0 = vcmp.lt.f32.partialorder %v105_v20, 0.0004427343 }
  0x4c   :  { %164 = vlog2.f32 %v108_v12  ;;  %v112_v21 = vadd.f32 1.0, %v111_v15  ;;  %vm115_vm1 = vcmp.lt.f32.partialorder %v114_v24, 0.0004427343 }
  0x4d   :  { %v104_v25 = vmul.f32 %v159_v8, %v103_v17 }
  0x4e   :  { %v113_v28 = vmul.f32 %v161_v9, %v112_v21 }
  0x55   :  { %v163_v26 = vpop.eup %162 }
  0x56   :  { %v165_v29 = vpop.eup %164  ;;  %v101_v31 = vmul.f32 0.6931472, %v163_v26 }
  0x57   :  { %v110_v32 = vmul.f32 0.6931472, %v165_v29 }
  0x58   :  { %v107_v33 = vsel %vm106_vm0, %v104_v25, %v101_v31 }
  0x59   :  { %v116_v34 = vsel %vm115_vm1, %v113_v28, %v110_v32  ;;  %v117_v35 = vadd.f32 %v107_v33, %v89_v27 }
  0x5a   :  { %v118_v36 = vadd.f32 %v116_v34, %v90_v30 }
  0x5c   :  { %v119_v38 = vadd.f32 %v118_v36, %v117_v35 }
  0x5e   :  { %v122_v39 = vmul.f32 %v121_v37, %v119_v38 }
  0x60   :  { %124 = vst [vmem:[#allocation8] sm:$0xff] %v122_v39 }
  0x61   :  { %243 = shalt.err (!%p240_p0)
}
  0x62   :  { %s244_s27 = scalar_lea.hbm %s339_s3, 128 }
  0x63   :  { %p245_p1 = scmp.ne.s32.totalorder %s339_s3, %s244_s27  ;;  %p248_p2 = scmp.lt.u32.totalorder %s244_s27, %s339_s3 }
  0x65   :  { %p250_p3 = pnand %p248_p2, %p245_p1 }
  0x67   :  { %253 = shalt.err (!%p250_p3)
}
  0x68   :  { %134 = dma.vmem_to_hbm [thread:$0]  %s132_s23, 128, %s339_s3, [#allocation4]  }
  0x69   :  { %258 = dma.done.wait [#allocation4], 128  }
  0x6a   :  { %259 = vsyncadd [#allocation4], 4294967168 }
  0x6b   :  { %138 = vsyncpa [#allocation3], 1 }
  0x6c   :  { %139 = vsyncpa [#allocation6], 1 }
  0x6d   :  { %140 = vsyncpa [#allocation4], 1 }

</bundles_post_ra>
